<compile_context>
chip_gen: v6e
topology: v6e:2x2x1
jax: 0.10.0
libtpu: 0.0.40
codegen_flags: <defaults>
</compile_context>

<pallas_src>
import functools

import jax
import jax.numpy as jnp
from jax.experimental import pallas as pl
from jax.experimental.pallas import tpu as pltpu


def _round_up(x: int, m: int) -> int:
    return ((x + m - 1) // m) * m


def _device_kind() -> str:
    try:
        return jax.devices()[0].device_kind.lower()
    except Exception:
        return ""


def _default_tn() -> int:
    # v5e: 16 MiB scoped-VMEM default -> keep the double-buffered full-K
    # bf16 weight block (~2 * tn * K * 2B) around 10 MiB => tn=512.
    # v6e / v7x: 32 MiB default comfortably holds tn=1024 (~20 MiB).
    kind = _device_kind()
    if "v5" in kind:
        return 512
    return 1024


def linear_kernel(x_ref, w_ref, b_ref, o_ref):
    # x_ref: (tm, K) bf16;  w_ref: (K, tn) bf16;  b_ref: (1, tn) f32.
    # Single full-K MXU matmul, f32 accumulation, fused bias add.
    o_ref[...] = (
        jnp.dot(x_ref[...], w_ref[...], preferred_element_type=jnp.float32)
        + b_ref[...]
    )


def prepare_linear_params(weight, bias, *, tn=None):
    """One-time (model-load-time) parameter prep.

    weight: (N, K) float32  (PyTorch nn.Linear convention)
    bias:   (N,)   float32
    Returns (w_kn, b2, tn):
      w_kn: (K, Np) bf16 — N zero-padded to a multiple of tn, pre-transposed.
      b2:   (1, Np) f32  — bias row, zero-padded.
    """
    if tn is None:
        tn = _default_tn()
    N, K = weight.shape
    tn = min(tn, _round_up(N, 128))
    Np = _round_up(N, tn)

    w_p = weight if Np == N else jnp.pad(weight, ((0, Np - N), (0, 0)))
    w_kn = jnp.asarray(w_p.T, dtype=jnp.bfloat16)          # (K, Np) bf16
    b_p = bias if Np == N else jnp.pad(bias, (0, Np - N))
    b2 = jnp.asarray(b_p.reshape(1, Np), dtype=jnp.float32)

    return jax.block_until_ready(w_kn), jax.block_until_ready(b2), tn


@functools.partial(jax.jit, static_argnames=("n_out", "tn", "tm_cap"))
def linear_pallas(x, w_kn, b2, *, n_out, tn, tm_cap=128):
    """y = x @ W^T + b with pre-prepared (K, Np) bf16 weight.

    x:    (M, K) float32
    w_kn: (K, Np) bfloat16   (from prepare_linear_params)
    b2:   (1, Np) float32
    returns (M, n_out) float32
    """
    M, K = x.shape
    Kw, Np = w_kn.shape
    assert K == Kw, "in_features mismatch"
    assert Np % tn == 0, "weight was prepared with a different tn"

    # Cap tm so large batches don't scale the full-K x / output blocks
    # past the scoped-VMEM budget.
    if M <= tm_cap:
        tm = _round_up(M, 8)
        Mp = tm
    else:
        tm = tm_cap
        Mp = _round_up(M, tm)

    x_p = x.astype(jnp.bfloat16)
    if Mp != M:
        x_p = jnp.pad(x_p, ((0, Mp - M), (0, 0)))

    grid = (Mp // tm, Np // tn)

    # v7x: shard the N axis across both TensorCores (each streams half the
    # weight).  Single-TC generations just use plain "parallel".
    kind = _device_kind()
    if ("v7" in kind or "7x" in kind) and grid[1] % 2 == 0:
        dim_sem = (pltpu.PARALLEL, pltpu.CORE_PARALLEL)
    else:
        dim_sem = ("parallel", "parallel")

    cost = pl.CostEstimate(
        flops=2 * Mp * Np * K,
        transcendentals=0,
        bytes_accessed=Mp * K * 2 + K * Np * 2 + Np * 4 + Mp * Np * 4,
    )

    out = pl.pallas_call(
        linear_kernel,
        out_shape=jax.ShapeDtypeStruct((Mp, Np), jnp.float32),
        grid_spec=pltpu.PrefetchScalarGridSpec(
            num_scalar_prefetch=0,
            grid=grid,
            in_specs=[
                pl.BlockSpec((tm, K), lambda i, j: (i, 0)),   # x: full-K row block
                pl.BlockSpec((K, tn), lambda i, j: (0, j)),   # W^T: full-K col block
                pl.BlockSpec((1, tn), lambda i, j: (0, j)),   # bias row
            ],
            out_specs=pl.BlockSpec((tm, tn), lambda i, j: (i, j)),
        ),
        compiler_params=pltpu.CompilerParams(dimension_semantics=dim_sem),
        cost_estimate=cost,
    )(x_p, w_kn, b2)

    return out[:M, :n_out]


if __name__ == "__main__":
    # Scaled-down stand-in for nn.Linear(5000, 5000): Linear(500, 500), batch=8.
    # 500 is deliberately NOT (8,128)-aligned: exercises the full-K block
    # (block dim == full array dim) and the N-padding path the real module
    # also needs.
    batch, in_features, out_features = 8, 500, 500

    key = jax.random.PRNGKey(0)
    kx, kw, kb = jax.random.split(key, 3)

    # nn.Linear-style uniform(-1/sqrt(K), 1/sqrt(K)) init.
    bound = 1.0 / (in_features ** 0.5)
    weight = jax.random.uniform(
        kw, (out_features, in_features), jnp.float32, minval=-bound, maxval=bound
    )
    bias = jax.random.uniform(
        kb, (out_features,), jnp.float32, minval=-bound, maxval=bound
    )
    x = jax.random.normal(kx, (batch, in_features), jnp.float32)

    # Pure-JAX f32 reference of nn.Linear.forward.
    y_ref = x @ weight.T + bias

    # (1) Default (generation-aware) tiles — single N block at this size.
    w_kn, b2, tn = prepare_linear_params(weight, bias)
    y = jax.block_until_ready(
        linear_pallas(x, w_kn, b2, n_out=out_features, tn=tn)
    )
    assert y.shape == (batch, out_features)
    err = jnp.max(jnp.abs(y - y_ref))
    assert jnp.allclose(y, y_ref, atol=2e-2, rtol=2e-2), (
        f"mismatch vs reference (max abs err {err})"
    )

    # (2) Force tn=128 so the multi-N-tile writeback + N-padding path is
    #     exercised too (addresses the single-tile-demo concern).
    w_kn2, b2_2, tn2 = prepare_linear_params(weight, bias, tn=128)
    y2 = jax.block_until_ready(
        linear_pallas(x, w_kn2, b2_2, n_out=out_features, tn=tn2)
    )
    err2 = jnp.max(jnp.abs(y2 - y_ref))
    assert jnp.allclose(y2, y_ref, atol=2e-2, rtol=2e-2), (
        f"multi-tile mismatch vs reference (max abs err {err2})"
    )

    # TODO(synk): the `.to(device)` / `.cpu()` RPC comm_mode plumbing of the
    # original module is host-side transfer glue with no kernel equivalent.
    print("KERNEL_OK")
</pallas_src>

<mosaic_0001>
module attributes {stable_mosaic.version = 11 : i64} {
  func.func @linear_kernel(%arg0: i32, %arg1: i32, %arg2: memref<8x500xbf16, #tpu.memory_space<vmem>>, %arg3: memref<500x512xbf16, #tpu.memory_space<vmem>>, %arg4: memref<1x512xf32, #tpu.memory_space<vmem>>, %arg5: memref<8x512xf32, #tpu.memory_space<vmem>>) attributes {dimension_semantics = [#tpu.dimension_semantics<parallel>, #tpu.dimension_semantics<parallel>], iteration_bounds = array<i64: 1, 1>, scalar_prefetch = 0 : i64, scratch_operands = 0 : i64, tpu.core_type = #tpu.core_type<tc>, window_params = [{transform_indices = @transform_0, window_bounds = array<i64: 8, 500>}, {transform_indices = @transform_1, window_bounds = array<i64: 500, 512>}, {transform_indices = @transform_2, window_bounds = array<i64: 1, 512>}, {transform_indices = @transform_3, window_bounds = array<i64: 8, 512>}]} {
    %c0 = arith.constant 0 : index
    %c0_0 = arith.constant 0 : index
    %0 = vector.load %arg2[%c0, %c0_0] : memref<8x500xbf16, #tpu.memory_space<vmem>>, vector<8x500xbf16>
    %c0_1 = arith.constant 0 : index
    %c0_2 = arith.constant 0 : index
    %1 = vector.load %arg3[%c0_1, %c0_2] : memref<500x512xbf16, #tpu.memory_space<vmem>>, vector<500x512xbf16>
    %cst = arith.constant dense<0.000000e+00> : vector<8x512xf32>
    %2 = tpu.matmul %0, %1, %cst {dimension_numbers = #tpu.dot_dimension_numbers<[1], [0], [0], [1], [0, 0, 1, 1], [], []>} : vector<8x500xbf16>, vector<500x512xbf16>, vector<8x512xf32> -> vector<8x512xf32>
    %c0_3 = arith.constant 0 : index
    %c0_4 = arith.constant 0 : index
    %3 = vector.load %arg4[%c0_3, %c0_4] : memref<1x512xf32, #tpu.memory_space<vmem>>, vector<1x512xf32>
    %4 = vector.broadcast %3 : vector<1x512xf32> to vector<8x512xf32>
    %5 = arith.addf %2, %4 : vector<8x512xf32>
    %c0_5 = arith.constant 0 : index
    %c0_6 = arith.constant 0 : index
    %6 = vector.load %arg5[%c0_5, %c0_6] : memref<8x512xf32, #tpu.memory_space<vmem>>, vector<8x512xf32>
    tpu.vector_store %arg5[%c0_5, %c0_6], %5 {strides = array<i32>} : memref<8x512xf32, #tpu.memory_space<vmem>>, vector<8x512xf32>,
    return
  }
  func.func @transform_0(%arg0: i32, %arg1: i32) -> (i32, i32) {
    %c0_i32 = arith.constant 0 : i32
    %c0_i32_0 = arith.constant 0 : i32
    return %arg0, %c0_i32 : i32, i32
  }
  func.func @transform_1(%arg0: i32, %arg1: i32) -> (i32, i32) {
    %c0_i32 = arith.constant 0 : i32
    %c0_i32_0 = arith.constant 0 : i32
    return %c0_i32, %arg1 : i32, i32
  }
  func.func @transform_2(%arg0: i32, %arg1: i32) -> (i32, i32) {
    %c0_i32 = arith.constant 0 : i32
    %c0_i32_0 = arith.constant 0 : i32
    return %c0_i32, %arg1 : i32, i32
  }
  func.func @transform_3(%arg0: i32, %arg1: i32) -> (i32, i32) {
    %c0_i32 = arith.constant 0 : i32
    return %arg0, %arg1 : i32, i32
  }
}

</mosaic_0001>

<bundles_post_ra>
// kernel: linear_pallas.1
= control target key start
LH: loop header
LB: loop body
LE: loop exit
PB: predicated region body
PF: predicated region fallthrough
CT: control target
= control target key end

     0   :  { %8 = vsyncpa [#allocation3], 0  ;;  %s1461_s0 = inlined_call_operand.vmem [shape: bf16[8,500], index: 0, kind: input, shape index: {}]   ;;  %s1462_s1 = inlined_call_operand.hbm [shape: bf16[500,512], index: 1, kind: input, shape index: {}]   ;;  %s1463_s2 = inlined_call_operand.vmem [shape: f32[1,512], index: 2, kind: input, shape index: {}]   ;;  %s1464_s3 = inlined_call_operand.hbm [shape: f32[8,512], index: 3, kind: output, shape index: {}]  }
   0x1   :  { %9 = vsyncpa [#allocation4], 0  ;;  %s1400_s12 = smov [#allocation2]  }
   0x2   :  { %s17_s13 = sshll.u32 %s1400_s12, 4  ;;  %s18_s13 = int_to_ptr.vmem [resolvable:$true] %s17_s13 }
   0x3   :  { %s1364_s14 = scalar_lea.vmem %s18_s13, 16128  ;;  %p1369_p1 = scmp.lt.s32.totalorder %s18_s13, %s18_s13 }
   0x4   :  { %p1365_p0 = scmp.ne.s32.totalorder %s18_s13, %s1364_s14  ;;  %p1370_p2 = scmp.lt.s32.totalorder %s1364_s14, %s1364_s14 }
   0x6   :  { %p1371_p3 = por %p1370_p2, %p1369_p1 }
   0x8   :  { %p1372_p4 = pnand %p1371_p3, %p1365_p0 }
   0xa   :  { %1375 = shalt.err (!%p1372_p4)
}
   0xb   :  { %s1401_s15 = smov 256   ;;  %s1402_s16 = smov 16  }
   0xc   :  { %23 = dma.hbm_to_vmem [thread:$0]  %s1462_s1, 16128, %s18_s13, [#allocation3], %s1401_s15, %s1401_s15, %s1402_s16  }
   0xd   :  { %1396 = dma.done.wait [#allocation3], 16128  }
   0xe   :  { %1397 = vsyncadd [#allocation3], 4294951168  ;;  %v1162_v0 = vld [vmem:[#allocation2 + $0xe4] ss:$16 sps:$4 sm:$0xff]   ;;  %v1166_v2 = vld [vmem:[#allocation2 + $0xe0] ss:$16 sps:$4 sm:$0xff]  }
   0xf   :  { %v1164_v1 = vld [vmem:[#allocation2 + $0x2e4] ss:$16 sps:$4 sm:$0xff]   ;;  %839 = vmatprep.subr.bf16.mxu0 %v1162_v0  ;;  %v1167_v3 = vld [vmem:[#allocation2 + $0x2e0] ss:$16 sps:$4 sm:$0xff]   ;;  %vm826_vm0 = vcmask 1041408   ;;  %v30_v50 = vld [vmem:[%s1461_s0 + $0x8] sm:$0xff] }
  0x10   :  { %880 = vmatprep.subr.bf16.mxu1 %v1164_v1  ;;  %v1168_v4 = vld [vmem:[#allocation2 + $0xc4] ss:$16 sps:$4 sm:$0xff]   ;;  %840 = vmatpush1.bf16.msra.mxu0 %v1166_v2  ;;  %v1172_v6 = vld [vmem:[#allocation2 + $0xc0] ss:$16 sps:$4 sm:$0xff]   ;;  %v1437_v52 = vcombine.high %v30_v50, %v30_v50  ;;  %vm822_vm1 = vcmask 949248  }
  0x11   :  { %881 = vmatpush1.bf16.msra.mxu1 %v1167_v3  ;;  %v1170_v5 = vld [vmem:[#allocation2 + $0x2c4] ss:$16 sps:$4 sm:$0xff]   ;;  %841 = vmatprep.subr.bf16.mxu0 %v1168_v4  ;;  %v1173_v7 = vld [vmem:[#allocation2 + $0x2c0] ss:$16 sps:$4 sm:$0xff]  }
  0x12   :  { %882 = vmatprep.subr.bf16.mxu1 %v1170_v5  ;;  %v1174_v8 = vld [vmem:[#allocation2 + $0xa4] ss:$16 sps:$4 sm:$0xff]   ;;  %v1178_v10 = vld [vmem:[#allocation2 + $0xa0] ss:$16 sps:$4 sm:$0xff]   ;;  %1155 = vmatprep.mubr.msk.bf16.mxu1 %vm822_vm1, %v1437_v52 }
  0x13   :  { %v1176_v9 = vld [vmem:[#allocation2 + $0x2a4] ss:$16 sps:$4 sm:$0xff]   ;;  %v1179_v11 = vld [vmem:[#allocation2 + $0x2a0] ss:$16 sps:$4 sm:$0xff]  }
  0x14   :  { %842 = vmatpush1.bf16.msra.mxu0 %v1172_v6  ;;  %v1180_v12 = vld [vmem:[#allocation2 + $0x84] ss:$16 sps:$4 sm:$0xff]   ;;  %v1184_v14 = vld [vmem:[#allocation2 + $0x80] ss:$16 sps:$4 sm:$0xff]   ;;  %v1263_v6 = vld [vmem:[#allocation2 + $0xec] ss:$16 sps:$4 sm:$0xff]  }
  0x15   :  { %883 = vmatpush1.bf16.msra.mxu1 %v1173_v7  ;;  %843 = vmatprep.subr.bf16.mxu0 %v1174_v8  ;;  %v1182_v13 = vld [vmem:[#allocation2 + $0x284] ss:$16 sps:$4 sm:$0xff]   ;;  %v1185_v15 = vld [vmem:[#allocation2 + $0x280] ss:$16 sps:$4 sm:$0xff]   ;;  %v1266_v7 = vld [vmem:[#allocation2 + $0x2ec] ss:$16 sps:$4 sm:$0xff]  }
  0x16   :  { %884 = vmatprep.subr.bf16.mxu1 %v1176_v9  ;;  %v1186_v16 = vld [vmem:[#allocation2 + $0x64] ss:$16 sps:$4 sm:$0xff]   ;;  %v1190_v18 = vld [vmem:[#allocation2 + $0x60] ss:$16 sps:$4 sm:$0xff]   ;;  %v1444_v9 = vcombine.low %v30_v50, %v30_v50  ;;  %v1322_v50 = vld [vmem:[#allocation2 + $0x1ac] ss:$16 sps:$4 sm:$0xff]  }
  0x17   :  { %v1188_v17 = vld [vmem:[#allocation2 + $0x264] ss:$16 sps:$4 sm:$0xff]   ;;  %v1191_v19 = vld [vmem:[#allocation2 + $0x260] ss:$16 sps:$4 sm:$0xff]  }
  0x18   :  { %844 = vmatpush1.bf16.msra.mxu0 %v1178_v10  ;;  %v1192_v20 = vld [vmem:[#allocation2 + $0x44] ss:$16 sps:$4 sm:$0xff]   ;;  %v1196_v22 = vld [vmem:[#allocation2 + $0x40] ss:$16 sps:$4 sm:$0xff]   ;;  %v1261_v10 = vld [vmem:[#allocation2 + $0xe8] ss:$16 sps:$4 sm:$0xff]  }
  0x19   :  { %885 = vmatpush1.bf16.msra.mxu1 %v1179_v11  ;;  %845 = vmatprep.subr.bf16.mxu0 %v1180_v12  ;;  %v1194_v21 = vld [vmem:[#allocation2 + $0x244] ss:$16 sps:$4 sm:$0xff]   ;;  %v1197_v23 = vld [vmem:[#allocation2 + $0x240] ss:$16 sps:$4 sm:$0xff]   ;;  %v1264_v11 = vld [vmem:[#allocation2 + $0x2e8] ss:$16 sps:$4 sm:$0xff]  }
  0x1a   :  { %886 = vmatprep.subr.bf16.mxu1 %v1182_v13  ;;  %v1198_v24 = vld [vmem:[#allocation2 + $0x24] ss:$16 sps:$4 sm:$0xff]   ;;  %v1202_v26 = vld [vmem:[#allocation2 + $0x20] ss:$16 sps:$4 sm:$0xff]   ;;  %v1269_v12 = vld [vmem:[#allocation2 + $0xcc] ss:$16 sps:$4 sm:$0xff]  }
  0x1b   :  { %v1200_v25 = vld [vmem:[#allocation2 + $0x224] ss:$16 sps:$4 sm:$0xff]   ;;  %v1203_v27 = vld [vmem:[#allocation2 + $0x220] ss:$16 sps:$4 sm:$0xff]   ;;  %v1272_v13 = vld [vmem:[#allocation2 + $0x2cc] ss:$16 sps:$4 sm:$0xff]  }
  0x1c   :  { %846 = vmatpush1.bf16.msra.mxu0 %v1184_v14  ;;  %v1204_v28 = vld [vmem:[#allocation2 + $0x4] ss:$16 sps:$4 sm:$0xff]   ;;  %v1208_v31 = vld [vmem:[#allocation2] ss:$16 sps:$4 sm:$0xff]   ;;  %v1267_v14 = vld [vmem:[#allocation2 + $0xc8] ss:$16 sps:$4 sm:$0xff]  }
  0x1d   :  { %887 = vmatpush1.bf16.msra.mxu1 %v1185_v15  ;;  %847 = vmatprep.subr.bf16.mxu0 %v1186_v16  ;;  %v1206_v29 = vld [vmem:[#allocation2 + $0x204] ss:$16 sps:$4 sm:$0xff]   ;;  %v1209_v32 = vld [vmem:[#allocation2 + $0x200] ss:$16 sps:$4 sm:$0xff]   ;;  %v1270_v15 = vld [vmem:[#allocation2 + $0x2c8] ss:$16 sps:$4 sm:$0xff]  }
  0x1e   :  { %888 = vmatprep.subr.bf16.mxu1 %v1188_v17  ;;  %v155_v30 = vld [vmem:[#allocation2 + $0x3e0] sm:$0x33]  ;;  %v1275_v16 = vld [vmem:[#allocation2 + $0xac] ss:$16 sps:$4 sm:$0xff]  }
  0x1f   :  { %v1210_v33 = vld [vmem:[#allocation2 + $0x1e4] ss:$16 sps:$4 sm:$0xff]   ;;  %v1151_v34 = vcombine.high %v155_v30, %v155_v30  ;;  %v1150_v35 = vcombine.low %v155_v30, %v155_v30  ;;  %v1213_v36 = vld [vmem:[#allocation2 + $0x1e0] ss:$16 sps:$4 sm:$0xff]   ;;  %v1278_v17 = vld [vmem:[#allocation2 + $0x2ac] ss:$16 sps:$4 sm:$0xff]  }
  0x20   :  { %848 = vmatpush1.bf16.msra.mxu0 %v1190_v18  ;;  %v1215_v38 = vld [vmem:[#allocation2 + $0x1c4] ss:$16 sps:$4 sm:$0xff]   ;;  %v1219_v40 = vld [vmem:[#allocation2 + $0x1c0] ss:$16 sps:$4 sm:$0xff]   ;;  %v1273_v18 = vld [vmem:[#allocation2 + $0xa8] ss:$16 sps:$4 sm:$0xff]  }
  0x21   :  { %889 = vmatpush1.bf16.msra.mxu1 %v1191_v19  ;;  %849 = vmatprep.subr.bf16.mxu0 %v1192_v20  ;;  %v828_v37 = vsel %vm826_vm0, %v1150_v35, 0  ;;  %v1217_v39 = vld [vmem:[#allocation2 + $0x3c4] ss:$16 sps:$4 sm:$0xff]   ;;  %v1220_v41 = vld [vmem:[#allocation2 + $0x3c0] ss:$16 sps:$4 sm:$0xff]  }
  0x22   :  { %890 = vmatprep.subr.bf16.mxu1 %v1194_v21  ;;  %v1221_v42 = vld [vmem:[#allocation2 + $0x1a4] ss:$16 sps:$4 sm:$0xff]   ;;  %v1225_v44 = vld [vmem:[#allocation2 + $0x1a0] ss:$16 sps:$4 sm:$0xff]   ;;  %v1276_v19 = vld [vmem:[#allocation2 + $0x2a8] ss:$16 sps:$4 sm:$0xff]  }
  0x23   :  { %v1223_v43 = vld [vmem:[#allocation2 + $0x3a4] ss:$16 sps:$4 sm:$0xff]   ;;  %v1226_v45 = vld [vmem:[#allocation2 + $0x3a0] ss:$16 sps:$4 sm:$0xff]   ;;  %v1281_v20 = vld [vmem:[#allocation2 + $0x8c] ss:$16 sps:$4 sm:$0xff]  }
  0x24   :  { %850 = vmatpush1.bf16.msra.mxu0 %v1196_v22  ;;  %v1227_v46 = vld [vmem:[#allocation2 + $0x184] ss:$16 sps:$4 sm:$0xff]   ;;  %v1231_v51 = vld [vmem:[#allocation2 + $0x180] ss:$16 sps:$4 sm:$0xff]   ;;  %v1284_v21 = vld [vmem:[#allocation2 + $0x28c] ss:$16 sps:$4 sm:$0xff]  }
  0x25   :  { %891 = vmatpush1.bf16.msra.mxu1 %v1197_v23  ;;  %851 = vmatprep.subr.bf16.mxu0 %v1198_v24  ;;  %v1229_v47 = vld [vmem:[#allocation2 + $0x384] ss:$16 sps:$4 sm:$0xff]   ;;  %v1232_v53 = vld [vmem:[#allocation2 + $0x380] ss:$16 sps:$4 sm:$0xff]   ;;  %v1279_v22 = vld [vmem:[#allocation2 + $0x88] ss:$16 sps:$4 sm:$0xff]  }
  0x26   :  { %892 = vmatprep.subr.bf16.mxu1 %v1200_v25  ;;  %v29_v48 = vld [vmem:[%s1461_s0] sm:$0xff]  ;;  %v1282_v23 = vld [vmem:[#allocation2 + $0x288] ss:$16 sps:$4 sm:$0xff]   ;;  %v1287_v24 = vld [vmem:[#allocation2 + $0x6c] ss:$16 sps:$4 sm:$0xff]  }
  0x27   :  { %v1432_v49 = vcombine.high %v29_v48, %v29_v48  ;;  %v1233_v54 = vld [vmem:[#allocation2 + $0x164] ss:$16 sps:$4 sm:$0xff]   ;;  %v1237_v56 = vld [vmem:[#allocation2 + $0x160] ss:$16 sps:$4 sm:$0xff]   ;;  %v1442_v8 = vcombine.low %v29_v48, %v29_v48  ;;  %v1290_v25 = vld [vmem:[#allocation2 + $0x26c] ss:$16 sps:$4 sm:$0xff]  }
  0x28   :  { %852 = vmatpush1.bf16.msra.mxu0 %v1202_v26  ;;  %v1235_v55 = vld [vmem:[#allocation2 + $0x364] ss:$16 sps:$4 sm:$0xff]   ;;  %v1238_v57 = vld [vmem:[#allocation2 + $0x360] ss:$16 sps:$4 sm:$0xff]   ;;  %v1285_v26 = vld [vmem:[#allocation2 + $0x68] ss:$16 sps:$4 sm:$0xff]  }
  0x29   :  { %893 = vmatpush1.bf16.msra.mxu1 %v1203_v27  ;;  %853 = vmatprep.subr.bf16.mxu0 %v1204_v28  ;;  %v1239_v58 = vld [vmem:[#allocation2 + $0x144] ss:$16 sps:$4 sm:$0xff]   ;;  %v1243_v60 = vld [vmem:[#allocation2 + $0x140] ss:$16 sps:$4 sm:$0xff]   ;;  %v1288_v27 = vld [vmem:[#allocation2 + $0x268] ss:$16 sps:$4 sm:$0xff]  }
  0x2a   :  { %894 = vmatprep.subr.bf16.mxu1 %v1206_v29  ;;  %871 = vmatprep.mubr.bf16.mxu0 %v1432_v49  ;;  %v1241_v59 = vld [vmem:[#allocation2 + $0x344] ss:$16 sps:$4 sm:$0xff]   ;;  %v1244_v61 = vld [vmem:[#allocation2 + $0x340] ss:$16 sps:$4 sm:$0xff]   ;;  %v1293_v28 = vld [vmem:[#allocation2 + $0x4c] ss:$16 sps:$4 sm:$0xff]  }
  0x2b   :  { %v1245_v62 = vld [vmem:[#allocation2 + $0x124] ss:$16 sps:$4 sm:$0xff]   ;;  %v1249_v0 = vld [vmem:[#allocation2 + $0x120] ss:$16 sps:$4 sm:$0xff]   ;;  %v1296_v29 = vld [vmem:[#allocation2 + $0x24c] ss:$16 sps:$4 sm:$0xff]  }
  0x2c   :  { %854 = vmatpush1.bf16.msra.mxu0 %v1208_v31  ;;  %v1247_v63 = vld [vmem:[#allocation2 + $0x324] ss:$16 sps:$4 sm:$0xff]   ;;  %v1250_v1 = vld [vmem:[#allocation2 + $0x320] ss:$16 sps:$4 sm:$0xff]   ;;  %v1291_v30 = vld [vmem:[#allocation2 + $0x48] ss:$16 sps:$4 sm:$0xff]  }
  0x2d   :  { %895 = vmatpush1.bf16.msra.mxu1 %v1209_v32  ;;  %855 = vmatprep.subr.bf16.mxu0 %v1210_v33  ;;  %v1251_v2 = vld [vmem:[#allocation2 + $0x104] ss:$16 sps:$4 sm:$0xff]   ;;  %v1255_v4 = vld [vmem:[#allocation2 + $0x100] ss:$16 sps:$4 sm:$0xff]   ;;  %v1294_v31 = vld [vmem:[#allocation2 + $0x248] ss:$16 sps:$4 sm:$0xff]  }
  0x2e   :  { %1154 = vmatprep.subr.msk.bf16.mxu1 %vm826_vm0, %v1151_v34  ;;  %v1253_v3 = vld [vmem:[#allocation2 + $0x304] ss:$16 sps:$4 sm:$0xff]   ;;  %v1256_v5 = vld [vmem:[#allocation2 + $0x300] ss:$16 sps:$4 sm:$0xff]   ;;  %v1299_v32 = vld [vmem:[#allocation2 + $0x2c] ss:$16 sps:$4 sm:$0xff]  }
  0x2f   :  { %v1302_v33 = vld [vmem:[#allocation2 + $0x22c] ss:$16 sps:$4 sm:$0xff]   ;;  %v1297_v34 = vld [vmem:[#allocation2 + $0x28] ss:$16 sps:$4 sm:$0xff]  }
  0x30   :  { %856 = vmatpush2.bf16.msra.mxu0 %v1213_v36  ;;  %v1300_v35 = vld [vmem:[#allocation2 + $0x228] ss:$16 sps:$4 sm:$0xff]   ;;  %v1305_v36 = vld [vmem:[#allocation2 + $0xc] ss:$16 sps:$4 sm:$0xff]  }
  0x31   :  { %897 = vmatpush2.bf16.msra.mxu1 %v828_v37  ;;  %857 = vmatprep.subr.bf16.mxu0 %v1215_v38  ;;  %v1308_v37 = vld [vmem:[#allocation2 + $0x20c] ss:$16 sps:$4 sm:$0xff]   ;;  %v1314_v48 = vld [vmem:[#allocation2 + $0x1c8] ss:$16 sps:$4 sm:$0xff]  }
  0x32   :  { %898 = vmatprep.subr.bf16.mxu1 %v1217_v39  ;;  %v156_v38 = vld [vmem:[#allocation2 + $0x3e8] sm:$0x33] }
  0x33   :  { %v1303_v39 = vld [vmem:[#allocation2 + $0x8] ss:$16 sps:$4 sm:$0xff]  }
  0x34   :  { %858 = vmatpush2.bf16.msra.mxu0 %v1219_v40  ;;  %v1306_v40 = vld [vmem:[#allocation2 + $0x208] ss:$16 sps:$4 sm:$0xff]  }
  0x35   :  { %899 = vmatpush2.bf16.msra.mxu1 %v1220_v41  ;;  %859 = vmatprep.subr.bf16.mxu0 %v1221_v42  ;;  %v1311_v41 = vld [vmem:[#allocation2 + $0x1ec] ss:$16 sps:$4 sm:$0xff]   ;;  %v1153_v42 = vcombine.high %v156_v38, %v156_v38 }
  0x36   :  { %900 = vmatprep.subr.bf16.mxu1 %v1223_v43  ;;  %v1152_v43 = vcombine.low %v156_v38, %v156_v38 }
  0x38   :  { %860 = vmatpush2.bf16.msra.mxu0 %v1225_v44  ;;  %v1309_v44 = vld [vmem:[#allocation2 + $0x1e8] ss:$16 sps:$4 sm:$0xff]  }
  0x39   :  { %901 = vmatpush2.bf16.msra.mxu1 %v1226_v45  ;;  %861 = vmatprep.subr.bf16.mxu0 %v1227_v46  ;;  %v834_v45 = vsel %vm826_vm0, %v1152_v43, 0  ;;  %v1316_v46 = vld [vmem:[#allocation2 + $0x1cc] ss:$16 sps:$4 sm:$0xff]  }
  0x3a   :  { %902 = vmatprep.subr.bf16.mxu1 %v1229_v47  ;;  %v1319_v47 = vld [vmem:[#allocation2 + $0x3cc] ss:$16 sps:$4 sm:$0xff]  }
  0x3c   :  { %862 = vmatpush2.bf16.msra.mxu0 %v1231_v51  ;;  %v1325_v51 = vld [vmem:[#allocation2 + $0x3ac] ss:$16 sps:$4 sm:$0xff]  }
  0x3d   :  { %903 = vmatpush2.bf16.msra.mxu1 %v1232_v53  ;;  %863 = vmatprep.subr.bf16.mxu0 %v1233_v54  ;;  %v1323_v53 = vld [vmem:[#allocation2 + $0x3a8] ss:$16 sps:$4 sm:$0xff]   ;;  %v1328_v54 = vld [vmem:[#allocation2 + $0x18c] ss:$16 sps:$4 sm:$0xff]  }
  0x3e   :  { %904 = vmatprep.subr.bf16.mxu1 %v1235_v55  ;;  %v1331_v55 = vld [vmem:[#allocation2 + $0x38c] ss:$16 sps:$4 sm:$0xff]  }
  0x40   :  { %864 = vmatpush2.bf16.msra.mxu0 %v1237_v56  ;;  %v1326_v56 = vld [vmem:[#allocation2 + $0x188] ss:$16 sps:$4 sm:$0xff]  }
  0x41   :  { %905 = vmatpush2.bf16.msra.mxu1 %v1238_v57  ;;  %865 = vmatprep.subr.bf16.mxu0 %v1239_v58  ;;  %v1329_v57 = vld [vmem:[#allocation2 + $0x388] ss:$16 sps:$4 sm:$0xff]   ;;  %v1334_v58 = vld [vmem:[#allocation2 + $0x16c] ss:$16 sps:$4 sm:$0xff]  }
  0x42   :  { %906 = vmatprep.subr.bf16.mxu1 %v1241_v59  ;;  %v1337_v59 = vld [vmem:[#allocation2 + $0x36c] ss:$16 sps:$4 sm:$0xff]  }
  0x44   :  { %866 = vmatpush2.bf16.msra.mxu0 %v1243_v60  ;;  %v1332_v60 = vld [vmem:[#allocation2 + $0x168] ss:$16 sps:$4 sm:$0xff]  }
  0x45   :  { %907 = vmatpush2.bf16.msra.mxu1 %v1244_v61  ;;  %867 = vmatprep.subr.bf16.mxu0 %v1245_v62  ;;  %v1335_v61 = vld [vmem:[#allocation2 + $0x368] ss:$16 sps:$4 sm:$0xff]   ;;  %v1340_v62 = vld [vmem:[#allocation2 + $0x14c] ss:$16 sps:$4 sm:$0xff]  }
  0x46   :  { %908 = vmatprep.subr.bf16.mxu1 %v1247_v63  ;;  %v1343_v63 = vld [vmem:[#allocation2 + $0x34c] ss:$16 sps:$4 sm:$0xff]  }
  0x48   :  { %868 = vmatpush2.bf16.msra.mxu0 %v1249_v0  ;;  %v1338_v0 = vld [vmem:[#allocation2 + $0x148] ss:$16 sps:$4 sm:$0xff]  }
  0x49   :  { %909 = vmatpush2.bf16.msra.mxu1 %v1250_v1  ;;  %869 = vmatprep.subr.bf16.mxu0 %v1251_v2  ;;  %v1341_v1 = vld [vmem:[#allocation2 + $0x348] ss:$16 sps:$4 sm:$0xff]   ;;  %v1346_v2 = vld [vmem:[#allocation2 + $0x12c] ss:$16 sps:$4 sm:$0xff]  }
  0x4a   :  { %910 = vmatprep.subr.bf16.mxu1 %v1253_v3  ;;  %v1349_v3 = vld [vmem:[#allocation2 + $0x32c] ss:$16 sps:$4 sm:$0xff]  }
  0x4c   :  { %870 = vmatpush2.bf16.msra.mxu0 %v1255_v4  ;;  %v1344_v4 = vld [vmem:[#allocation2 + $0x128] ss:$16 sps:$4 sm:$0xff]  }
  0x4d   :  { %911 = vmatpush2.bf16.msra.mxu1 %v1256_v5  ;;  %921 = vmatprep.subr.bf16.mxu0 %v1263_v6  ;;  %v1347_v5 = vld [vmem:[#allocation2 + $0x328] ss:$16 sps:$4 sm:$0xff]   ;;  %v1352_v6 = vld [vmem:[#allocation2 + $0x10c] ss:$16 sps:$4 sm:$0xff]  }
  0x4e   :  { %962 = vmatprep.subr.bf16.mxu1 %v1266_v7  ;;  %v1355_v7 = vld [vmem:[#allocation2 + $0x30c] ss:$16 sps:$4 sm:$0xff]  }
  0x4f   :  { %872 = vmatmul.mubr.bf16.vlgmr.msra.gmra.mxu0 %v1442_v8 }
  0x50   :  { %913 = vmatmul.mubr.bf16.vlgmr.msra.gmra.mxu1 %v1444_v9  ;;  %922 = vmatpush1.bf16.msra.mxu0 %v1261_v10  ;;  %v1350_v10 = vld [vmem:[#allocation2 + $0x108] ss:$16 sps:$4 sm:$0xff]  }
  0x51   :  { %963 = vmatpush1.bf16.msra.mxu1 %v1264_v11  ;;  %923 = vmatprep.subr.bf16.mxu0 %v1269_v12  ;;  %v1353_v11 = vld [vmem:[#allocation2 + $0x308] ss:$16 sps:$4 sm:$0xff]   ;;  %v159_v12 = vlaneseq }
  0x52   :  { %964 = vmatprep.subr.bf16.mxu1 %v1272_v13  ;;  %953 = vmatprep.mubr.bf16.mxu0 %v1432_v49  ;;  %v1317_v49 = vld [vmem:[#allocation2 + $0x3c8] ss:$16 sps:$4 sm:$0xff]  }
  0x53   :  { %1157 = vmatprep.mubr.msk.bf16.mxu1 %vm822_vm1, %v1437_v52  ;;  %v1320_v52 = vld [vmem:[#allocation2 + $0x1a8] ss:$16 sps:$4 sm:$0xff]   ;;  %v160_v13 = vshrl.u32 %v159_v12, 7 }
  0x54   :  { %924 = vmatpush1.bf16.msra.mxu0 %v1267_v14 }
  0x55   :  { %965 = vmatpush1.bf16.msra.mxu1 %v1270_v15  ;;  %925 = vmatprep.subr.bf16.mxu0 %v1275_v16  ;;  %v161_v14 = vsub.s32 0, %v160_v13  ;;  %v157_v15 = vld [vmem:[%s1463_s2] sm:$0xf]  ;;  %v165_v16 = vsub.s32 1, %v160_v13  ;;  %s1403_s2 = smov [#allocation5]  }
  0x56   :  { %966 = vmatprep.subr.bf16.mxu1 %v1278_v17  ;;  %s1013_s23 = sshll.u32 %s1403_s2, 4  ;;  %s1014_s23 = int_to_ptr.vmem [resolvable:$true] %s1013_s23 }
  0x57   :  { %v162_v17 = vrot.slane %v157_v15, %v161_v14  ;;  %s1376_s24 = scalar_lea.vmem %s1014_s23, 512  ;;  %p1381_p6 = scmp.lt.s32.totalorder %s1014_s23, %s1014_s23 }
  0x58   :  { %926 = vmatpush1.bf16.msra.mxu0 %v1273_v18  ;;  %v166_v18 = vrot.slane %v157_v15, %v165_v16  ;;  %p1377_p5 = scmp.ne.s32.totalorder %s1014_s23, %s1376_s24  ;;  %p1382_p7 = scmp.lt.s32.totalorder %s1376_s24, %s1376_s24 }
  0x59   :  { %967 = vmatpush1.bf16.msra.mxu1 %v1276_v19  ;;  %927 = vmatprep.subr.bf16.mxu0 %v1281_v20 }
  0x5a   :  { %968 = vmatprep.subr.bf16.mxu1 %v1284_v21  ;;  %p1383_p8 = por %p1382_p7, %p1381_p6 }
  0x5c   :  { %928 = vmatpush1.bf16.msra.mxu0 %v1279_v22  ;;  %p1384_p9 = pnand %p1383_p8, %p1377_p5 }
  0x5d   :  { %969 = vmatpush1.bf16.msra.mxu1 %v1282_v23  ;;  %929 = vmatprep.subr.bf16.mxu0 %v1287_v24 }
  0x5e   :  { %970 = vmatprep.subr.bf16.mxu1 %v1290_v25 }
  0x60   :  { %930 = vmatpush1.bf16.msra.mxu0 %v1285_v26 }
  0x61   :  { %971 = vmatpush1.bf16.msra.mxu1 %v1288_v27  ;;  %931 = vmatprep.subr.bf16.mxu0 %v1293_v28 }
  0x62   :  { %972 = vmatprep.subr.bf16.mxu1 %v1296_v29  ;;  %v169_v29 = vsub.s32 2, %v160_v13 }
  0x64   :  { %932 = vmatpush1.bf16.msra.mxu0 %v1291_v30  ;;  %v173_v30 = vsub.s32 3, %v160_v13 }
  0x65   :  { %973 = vmatpush1.bf16.msra.mxu1 %v1294_v31  ;;  %933 = vmatprep.subr.bf16.mxu0 %v1299_v32  ;;  %v170_v31 = vrot.slane %v157_v15, %v169_v29 }
  0x66   :  { %974 = vmatprep.subr.bf16.mxu1 %v1302_v33  ;;  %v174_v32 = vrot.slane %v157_v15, %v173_v30 }
  0x68   :  { %934 = vmatpush1.bf16.msra.mxu0 %v1297_v34 }
  0x69   :  { %975 = vmatpush1.bf16.msra.mxu1 %v1300_v35  ;;  %935 = vmatprep.subr.bf16.mxu0 %v1305_v36 }
  0x6a   :  { %976 = vmatprep.subr.bf16.mxu1 %v1308_v37 }
  0x6c   :  { %936 = vmatpush1.bf16.msra.mxu0 %v1303_v39 }
  0x6d   :  { %977 = vmatpush1.bf16.msra.mxu1 %v1306_v40  ;;  %937 = vmatprep.subr.bf16.mxu0 %v1311_v41 }
  0x6e   :  { %1156 = vmatprep.subr.msk.bf16.mxu1 %vm826_vm0, %v1153_v42 }
  0x70   :  { %938 = vmatpush2.bf16.msra.mxu0 %v1309_v44 }
  0x71   :  { %979 = vmatpush2.bf16.msra.mxu1 %v834_v45  ;;  %939 = vmatprep.subr.bf16.mxu0 %v1316_v46 }
  0x72   :  { %980 = vmatprep.subr.bf16.mxu1 %v1319_v47 }
  0x74   :  { %940 = vmatpush2.bf16.msra.mxu0 %v1314_v48 }
  0x75   :  { %981 = vmatpush2.bf16.msra.mxu1 %v1317_v49  ;;  %941 = vmatprep.subr.bf16.mxu0 %v1322_v50 }
  0x76   :  { %982 = vmatprep.subr.bf16.mxu1 %v1325_v51 }
  0x78   :  { %942 = vmatpush2.bf16.msra.mxu0 %v1320_v52 }
  0x79   :  { %983 = vmatpush2.bf16.msra.mxu1 %v1323_v53  ;;  %943 = vmatprep.subr.bf16.mxu0 %v1328_v54 }
  0x7a   :  { %984 = vmatprep.subr.bf16.mxu1 %v1331_v55 }
  0x7c   :  { %944 = vmatpush2.bf16.msra.mxu0 %v1326_v56 }
  0x7d   :  { %985 = vmatpush2.bf16.msra.mxu1 %v1329_v57  ;;  %945 = vmatprep.subr.bf16.mxu0 %v1334_v58 }
  0x7e   :  { %986 = vmatprep.subr.bf16.mxu1 %v1337_v59 }
  0x80   :  { %946 = vmatpush2.bf16.msra.mxu0 %v1332_v60 }
  0x81   :  { %987 = vmatpush2.bf16.msra.mxu1 %v1335_v61  ;;  %947 = vmatprep.subr.bf16.mxu0 %v1340_v62 }
  0x82   :  { %988 = vmatprep.subr.bf16.mxu1 %v1343_v63 }
  0x84   :  { %948 = vmatpush2.bf16.msra.mxu0 %v1338_v0 }
  0x85   :  { %989 = vmatpush2.bf16.msra.mxu1 %v1341_v1  ;;  %949 = vmatprep.subr.bf16.mxu0 %v1346_v2 }
  0x86   :  { %990 = vmatprep.subr.bf16.mxu1 %v1349_v3 }
  0x88   :  { %950 = vmatpush2.bf16.msra.mxu0 %v1344_v4 }
  0x89   :  { %991 = vmatpush2.bf16.msra.mxu1 %v1347_v5  ;;  %951 = vmatprep.subr.bf16.mxu0 %v1352_v6 }
  0x8a   :  { %992 = vmatprep.subr.bf16.mxu1 %v1355_v7 }
  0x8c   :  { %952 = vmatpush2.bf16.msra.mxu0 %v1350_v10 }
  0x8d   :  { %993 = vmatpush2.bf16.msra.mxu1 %v1353_v11 }
  0x8f   :  { %954 = vmatmul.mubr.bf16.vlgmr.msra.gmra.mxu0 %v1442_v8 }
  0x90   :  { %995 = vmatmul.mubr.bf16.vlgmr.msra.gmra.mxu1 %v1444_v9 }
 0x10f   :  { %v873_v19 = vpop.f32.mrf.mxu0 }
 0x110   :  { %v914_v20 = vpop.f32.mrf.mxu1  ;;  %v874_v21 = vadd.f32 %v873_v19, %v162_v17 }
 0x111   :  { %v875_v22 = vpop.f32.mrf.mxu0 }
 0x112   :  { %v916_v23 = vpop.f32.mrf.mxu1  ;;  %v915_v24 = vadd.f32 %v914_v20, %v874_v21  ;;  %v876_v25 = vadd.f32 %v875_v22, %v166_v18 }
 0x113   :  { %v877_v8 = vpop.f32.mrf.mxu0 }
 0x114   :  { %v918_v26 = vpop.f32.mrf.mxu1  ;;  %1003 = vst [vmem:[#allocation5] sm:$0xff] %v915_v24  ;;  %v917_v9 = vadd.f32 %v916_v23, %v876_v25 }
 0x115   :  { %v878_v27 = vpop.f32.mrf.mxu0 }
 0x116   :  { %v919_v28 = vpop.f32.mrf.mxu1  ;;  %1004 = vst [vmem:[#allocation5 + $0x8] sm:$0xff] %v917_v9 }
 0x14f   :  { %v955_v33 = vpop.f32.mrf.mxu0 }
 0x150   :  { %v996_v34 = vpop.f32.mrf.mxu1  ;;  %v956_v35 = vadd.f32 %v955_v33, %v170_v31 }
 0x151   :  { %v957_v36 = vpop.f32.mrf.mxu0 }
 0x152   :  { %v998_v37 = vpop.f32.mrf.mxu1  ;;  %v997_v38 = vadd.f32 %v996_v34, %v956_v35  ;;  %v958_v39 = vadd.f32 %v957_v36, %v174_v32 }
 0x153   :  { %v959_v40 = vpop.f32.mrf.mxu0 }
 0x154   :  { %v1000_v41 = vpop.f32.mrf.mxu1  ;;  %1005 = vst [vmem:[#allocation5 + $0x10] sm:$0xff] %v997_v38  ;;  %v999_v42 = vadd.f32 %v998_v37, %v958_v39 }
 0x155   :  { %v960_v43 = vpop.f32.mrf.mxu0 }
 0x156   :  { %v1001_v44 = vpop.f32.mrf.mxu1  ;;  %1006 = vst [vmem:[#allocation5 + $0x18] sm:$0xff] %v999_v42 }
 0x157   :  { %1387 = shalt.err (!%p1384_p9)
}
 0x158   :  { %1016 = dma.vmem_to_hbm [thread:$0]  %s1014_s23, 512, %s1464_s3, [#allocation4]  }
 0x159   :  { %1398 = dma.done.wait [#allocation4], 512  }
 0x15a   :  { %1399 = vsyncadd [#allocation4], 4294966784 }
 0x15b   :  { %1020 = vsyncpa [#allocation3], 1 }
 0x15c   :  { %1021 = vsyncpa [#allocation4], 1 }

</bundles_post_ra>
